<compile_context>
chip_gen: v5e
topology: v5e:2x2
jax: 0.10.0
libtpu: 0.0.40
codegen_flags: <defaults>
</compile_context>

<pallas_src>
import jax
import jax.numpy as jnp
from jax.experimental import pallas as pl
from jax.experimental.pallas import tpu as pltpu

_LANES = 128


def _round_up(a, m):
    return ((a + m - 1) // m) * m


def _render_kernel(w_ref, b_ref, x_ref, o_ref):
    # w_ref, b_ref: (3,) f32 scalars in SMEM (resident across the grid)
    # x_ref:        (TILE_R, 128) f32, pixels lane-dense
    # o_ref:        (3, TILE_R, 128) f32, channel-major output
    x = x_ref[...]
    for c in range(o_ref.shape[0]):          # out_features = 3, static unroll
        o_ref[c, :, :] = x * w_ref[c] + b_ref[c]


def linear1to3_pallas(x, w, b, *, tile_rows=1024):
    """Pallas equivalent of nn.Linear(1, 3).

    x: [N, 1] (or [N]); w: [3] (== PyTorch weight[:, 0]); b: [3] -> [N, 3].
    Math is identical to x @ W.T + b for in_features == 1.
    """
    orig_dtype = x.dtype
    N = x.shape[0]
    M = w.shape[0]

    x_flat = x.reshape(N).astype(jnp.float32)

    # Lane-dense layout: pixels on the 128-lane axis, rows on the sublane axis.
    rows = pl.cdiv(N, _LANES)
    tile_rows = _round_up(max(8, min(tile_rows, _round_up(rows, 8))), 8)
    rows_pad = _round_up(rows, tile_rows)
    n_pad = rows_pad * _LANES

    x2 = jnp.pad(x_flat, (0, n_pad - N)).reshape(rows_pad, _LANES)

    out = pl.pallas_call(
        _render_kernel,
        out_shape=jax.ShapeDtypeStruct((M, rows_pad, _LANES), jnp.float32),
        grid=(rows_pad // tile_rows,),
        in_specs=[
            pl.BlockSpec(memory_space=pltpu.MemorySpace.SMEM),    # w (resident)
            pl.BlockSpec(memory_space=pltpu.MemorySpace.SMEM),    # b (resident)
            pl.BlockSpec((tile_rows, _LANES), lambda i: (i, 0)),  # x tile
        ],
        out_specs=pl.BlockSpec((M, tile_rows, _LANES), lambda i: (0, i, 0)),
        compiler_params=pltpu.CompilerParams(
            dimension_semantics=("parallel",),   # shard tiles across TCs
        ),
    )(w.astype(jnp.float32), b.astype(jnp.float32), x2)

    # (3, rows_pad, 128) -> (3, n_pad) -> [N, 3]
    return out.reshape(M, n_pad)[:, :N].T.astype(orig_dtype)


def simple_3d_rendering_forward(x, w, b):
    """Equivalent of Simple3DRenderingModel.forward: Linear(1 -> 3)."""
    # Note: for tiny N (e.g. the single middle-pixel demo in apply_3d_model),
    # plain XLA `x * w + b` beats any custom call; the Pallas path pays off
    # for large pixel batches.
    return linear1to3_pallas(x, w, b)


if __name__ == "__main__":
    key = jax.random.PRNGKey(0)
    k_w, k_b, k_x = jax.random.split(key, 3)

    in_features, out_features = 1, 3
    bound = 1.0 / (in_features ** 0.5)
    # PyTorch stores weight as [out, in]; in_features == 1, so keep the column.
    w = jax.random.uniform(k_w, (out_features,), jnp.float32, -bound, bound)
    b = jax.random.uniform(k_b, (out_features,), jnp.float32, -bound, bound)

    # Small batch of scalar inputs, shape [N, 1] (same convention as forward()).
    N = 2000
    x = jax.random.normal(k_x, (N, 1), jnp.float32)

    out = simple_3d_rendering_forward(x, w, b)              # single-tile path
    out = jax.block_until_ready(out)
    out_tiled = linear1to3_pallas(x, w, b, tile_rows=8)     # multi-tile grid
    out_tiled = jax.block_until_ready(out_tiled)

    # Reference: same math as PyTorch Linear (x @ W.T + b with W = w[:, None]).
    ref = x * w[None, :] + b[None, :]
    assert out.shape == (N, out_features)
    assert jnp.allclose(out, ref, atol=1e-6, rtol=1e-6)
    assert jnp.allclose(out_tiled, ref, atol=1e-6, rtol=1e-6)

    print("KERNEL_OK")
</pallas_src>

<mosaic_0001>
module attributes {stable_mosaic.version = 11 : i64} {
  func.func @_render_kernel(%arg0: i32, %arg1: memref<3xf32, #tpu.memory_space<smem>>, %arg2: memref<3xf32, #tpu.memory_space<smem>>, %arg3: memref<16x128xf32, #tpu.memory_space<vmem>>, %arg4: memref<3x16x128xf32, #tpu.memory_space<vmem>>) attributes {dimension_semantics = [#tpu.dimension_semantics<parallel>], iteration_bounds = array<i64: 1>, scalar_prefetch = 0 : i64, scratch_operands = 0 : i64, tpu.core_type = #tpu.core_type<tc>, window_params = [{transform_indices = @transform_0, window_bounds = array<i64: 3>}, {transform_indices = @transform_1, window_bounds = array<i64: 3>}, {transform_indices = @transform_2, window_bounds = array<i64: 16, 128>}, {transform_indices = @transform_3, window_bounds = array<i64: 3, 16, 128>}]} {
    %c0 = arith.constant 0 : index
    %c0_0 = arith.constant 0 : index
    %0 = vector.load %arg3[%c0, %c0_0] : memref<16x128xf32, #tpu.memory_space<vmem>>, vector<16x128xf32>
    %c0_1 = arith.constant 0 : index
    %1 = memref.load %arg1[%c0_1] : memref<3xf32, #tpu.memory_space<smem>>
    %2 = vector.broadcast %1 : f32 to vector<16x128xf32>
    %3 = arith.mulf %0, %2 : vector<16x128xf32>
    %c0_2 = arith.constant 0 : index
    %4 = memref.load %arg2[%c0_2] : memref<3xf32, #tpu.memory_space<smem>>
    %5 = vector.broadcast %4 : f32 to vector<16x128xf32>
    %6 = arith.addf %3, %5 : vector<16x128xf32>
    %c0_3 = arith.constant 0 : index
    %c0_4 = arith.constant 0 : index
    %c0_5 = arith.constant 0 : index
    %7 = vector.load %arg4[%c0_3, %c0_4, %c0_5] : memref<3x16x128xf32, #tpu.memory_space<vmem>>, vector<1x16x128xf32>
    %8 = vector.shape_cast %7 : vector<1x16x128xf32> to vector<16x128xf32>
    %9 = vector.shape_cast %6 : vector<16x128xf32> to vector<1x16x128xf32>
    tpu.vector_store %arg4[%c0_3, %c0_4, %c0_5], %9 {strides = array<i32>} : memref<3x16x128xf32, #tpu.memory_space<vmem>>, vector<1x16x128xf32>,
    %c1 = arith.constant 1 : index
    %10 = memref.load %arg1[%c1] : memref<3xf32, #tpu.memory_space<smem>>
    %11 = vector.broadcast %10 : f32 to vector<16x128xf32>
    %12 = arith.mulf %0, %11 : vector<16x128xf32>
    %c1_6 = arith.constant 1 : index
    %13 = memref.load %arg2[%c1_6] : memref<3xf32, #tpu.memory_space<smem>>
    %14 = vector.broadcast %13 : f32 to vector<16x128xf32>
    %15 = arith.addf %12, %14 : vector<16x128xf32>
    %c1_7 = arith.constant 1 : index
    %c0_8 = arith.constant 0 : index
    %c0_9 = arith.constant 0 : index
    %16 = vector.load %arg4[%c1_7, %c0_8, %c0_9] : memref<3x16x128xf32, #tpu.memory_space<vmem>>, vector<1x16x128xf32>
    %17 = vector.shape_cast %16 : vector<1x16x128xf32> to vector<16x128xf32>
    %18 = vector.shape_cast %15 : vector<16x128xf32> to vector<1x16x128xf32>
    tpu.vector_store %arg4[%c1_7, %c0_8, %c0_9], %18 {strides = array<i32>} : memref<3x16x128xf32, #tpu.memory_space<vmem>>, vector<1x16x128xf32>,
    %c2 = arith.constant 2 : index
    %19 = memref.load %arg1[%c2] : memref<3xf32, #tpu.memory_space<smem>>
    %20 = vector.broadcast %19 : f32 to vector<16x128xf32>
    %21 = arith.mulf %0, %20 : vector<16x128xf32>
    %c2_10 = arith.constant 2 : index
    %22 = memref.load %arg2[%c2_10] : memref<3xf32, #tpu.memory_space<smem>>
    %23 = vector.broadcast %22 : f32 to vector<16x128xf32>
    %24 = arith.addf %21, %23 : vector<16x128xf32>
    %c2_11 = arith.constant 2 : index
    %c0_12 = arith.constant 0 : index
    %c0_13 = arith.constant 0 : index
    %25 = vector.load %arg4[%c2_11, %c0_12, %c0_13] : memref<3x16x128xf32, #tpu.memory_space<vmem>>, vector<1x16x128xf32>
    %26 = vector.shape_cast %25 : vector<1x16x128xf32> to vector<16x128xf32>
    %27 = vector.shape_cast %24 : vector<16x128xf32> to vector<1x16x128xf32>
    tpu.vector_store %arg4[%c2_11, %c0_12, %c0_13], %27 {strides = array<i32>} : memref<3x16x128xf32, #tpu.memory_space<vmem>>, vector<1x16x128xf32>,
    return
  }
  func.func @transform_0(%arg0: i32) -> i32 {
    %c0_i32 = arith.constant 0 : i32
    %c0_i32_0 = arith.constant 0 : i32
    return %c0_i32 : i32
  }
  func.func @transform_1(%arg0: i32) -> i32 {
    %c0_i32 = arith.constant 0 : i32
    %c0_i32_0 = arith.constant 0 : i32
    return %c0_i32 : i32
  }
  func.func @transform_2(%arg0: i32) -> (i32, i32) {
    %c0_i32 = arith.constant 0 : i32
    %c0_i32_0 = arith.constant 0 : i32
    return %arg0, %c0_i32 : i32, i32
  }
  func.func @transform_3(%arg0: i32) -> (i32, i32, i32) {
    %c0_i32 = arith.constant 0 : i32
    %c0_i32_0 = arith.constant 0 : i32
    %c0_i32_1 = arith.constant 0 : i32
    return %c0_i32, %arg0, %c0_i32_0 : i32, i32, i32
  }
}

</mosaic_0001>

<bundles_post_ra>
// kernel: tpu_custom_call.1
= control target key start
LH: loop header
LB: loop body
LE: loop exit
PB: predicated region body
PF: predicated region fallthrough
CT: control target
= control target key end

     0   :  { %8 = vsyncpa [#allocation5], 0  ;;  %s245_s0 = inlined_call_operand.hbm [shape: f32[3], index: 0, kind: input, shape index: {}]   ;;  %s246_s1 = inlined_call_operand.hbm [shape: f32[3], index: 1, kind: input, shape index: {}]   ;;  %s247_s2 = inlined_call_operand.hbm [shape: f32[16,128], index: 2, kind: input, shape index: {}]   ;;  %s248_s3 = inlined_call_operand.hbm [shape: f32[3,16,128], index: 3, kind: output, shape index: {}]  }
   0x1   :  { %9 = vsyncpa [#allocation7], 0 }
   0x2   :  { %10 = vsyncpa [#allocation3], 0 }
   0x3   :  { %11 = vsyncpa [#allocation4], 0  ;;  %s17_s14 = sshll.u32 %s245_s0, 4  ;;  %s26_s17 = sshll.u32 %s246_s1, 4  ;;  %s18_s14 = int_to_ptr.hbm [resolvable:$true] %s17_s14  ;;  %s27_s17 = int_to_ptr.hbm [resolvable:$true] %s26_s17 }
   0x4   :  { %s201_s18 = smov [#allocation2]   ;;  %s202_s19 = smov [#allocation6]  }
   0x5   :  { %20 = dma.hbm_to_smem %s18_s14, 16, %s201_s18, [#allocation5]  }
   0x6   :  { %29 = dma.hbm_to_smem %s27_s17, 16, %s202_s19, [#allocation7]  }
   0x7   :  { %s34_s22 = sshll.u32 %s247_s2, 4  ;;  %s203_s23 = smov [#allocation8]   ;;  %s35_s22 = int_to_ptr.hbm [resolvable:$true] %s34_s22 }
   0x8   :  { %s36_s24 = sshll.u32 %s203_s23, 4  ;;  %s204_s25 = smov 128   ;;  %s37_s24 = int_to_ptr.vmem [resolvable:$true] %s36_s24 }
   0x9   :  { %s205_s0 = smov 8  }
   0xa   :  { %42 = dma.hbm_to_vmem [thread:$0]  %s35_s22, 256, %s37_s24, [#allocation3], %s204_s25, %s204_s25, %s205_s0  }
   0xb   :  { %193 = dma.done.wait [#allocation5], 16  }
   0xc   :  { %194 = vsyncadd [#allocation5], 4294967280 }
   0xd   :  { %195 = dma.done.wait [#allocation7], 16  }
   0xe   :  { %196 = vsyncadd [#allocation7], 4294967280 }
   0xf   :  { %197 = dma.done.wait [#allocation3], 256  }
  0x10   :  { %198 = vsyncadd [#allocation3], 4294967040 }
  0x11   :  { %55 = sfence }
  0x12   :  { %s58_s1 = sld [smem:[#allocation2]]  ;;  %v56_v0 = vld [vmem:[#allocation8] sm:$0xff]  ;;  %v57_v1 = vld [vmem:[#allocation8 + $0x8] sm:$0xff]  ;;  %s206_s30 = smov [#allocation9]  }
  0x13   :  { %s62_s26 = sld [smem:[#allocation6]]  ;;  %s94_s4 = sshll.u32 %s206_s30, 4  ;;  %s95_s4 = int_to_ptr.vmem [resolvable:$true] %s94_s4 }
  0x14   :  { %s111_s2 = sld [smem:[#allocation2 + $0x1]]  ;;  %s96_s7 = sshll.u32 %s248_s3, 4  ;;  %s97_s7 = int_to_ptr.hbm [resolvable:$true] %s96_s7 }
  0x15   :  { %s112_s27 = sld [smem:[#allocation6 + $0x1]] }
  0x16   :  { %s113_s28 = sld [smem:[#allocation2 + $0x2]] }
  0x17   :  { %s114_s29 = sld [smem:[#allocation6 + $0x2]] }
  0x18   :  { %v59_v2 = vstv %s58_s1 }
  0x19   :  { %v60_v3 = vmul.f32 %v59_v2, %v56_v0  ;;  %v63_v4 = vstv %s62_s26  ;;  %v61_v5 = vmul.f32 %v59_v2, %v57_v1 }
  0x1a   :  { %v69_v6 = vstv %s111_s2 }
  0x1b   :  { %v64_v7 = vadd.f32 %v63_v4, %v60_v3  ;;  %v65_v8 = vadd.f32 %v63_v4, %v61_v5  ;;  %v70_v9 = vmul.f32 %v69_v6, %v56_v0  ;;  %v73_v10 = vstv %s112_s27 }
  0x1c   :  { %v71_v11 = vmul.f32 %v69_v6, %v57_v1  ;;  %v80_v12 = vstv %s113_s28 }
  0x1d   :  { %66 = vst [vmem:[#allocation9] sm:$0xff] %v64_v7  ;;  %v74_v13 = vadd.f32 %v73_v10, %v70_v9  ;;  %v81_v14 = vmul.f32 %v80_v12, %v56_v0  ;;  %v84_v15 = vstv %s114_s29  ;;  %v82_v16 = vmul.f32 %v80_v12, %v57_v1 }
  0x1e   :  { %67 = vst [vmem:[#allocation9 + $0x8] sm:$0xff] %v65_v8  ;;  %v75_v17 = vadd.f32 %v73_v10, %v71_v11 }
  0x1f   :  { %77 = vst [vmem:[#allocation9 + $0x10] sm:$0xff] %v74_v13  ;;  %v85_v18 = vadd.f32 %v84_v15, %v81_v14  ;;  %v86_v19 = vadd.f32 %v84_v15, %v82_v16 }
  0x20   :  { %78 = vst [vmem:[#allocation9 + $0x18] sm:$0xff] %v75_v17 }
  0x21   :  { %88 = vst [vmem:[#allocation9 + $0x20] sm:$0xff] %v85_v18 }
  0x22   :  { %89 = vst [vmem:[#allocation9 + $0x28] sm:$0xff] %v86_v19 }
  0x23   :  { %102 = dma.vmem_to_hbm [thread:$0]  %s95_s4, 768, %s97_s7, [#allocation4], %s204_s25, %s204_s25, %s205_s0  }
  0x24   :  { %199 = dma.done.wait [#allocation4], 768  }
  0x25   :  { %200 = vsyncadd [#allocation4], 4294966528 }
  0x26   :  { %107 = vsyncpa [#allocation3], 1 }
  0x27   :  { %108 = vsyncpa [#allocation4], 1 }
  0x28   :  { %109 = vsyncpa [#allocation5], 1 }
  0x29   :  { %110 = vsyncpa [#allocation7], 1 }

</bundles_post_ra>
